<compile_context>
chip_gen: v6e
topology: v6e:2x2x1
jax: 0.10.0
libtpu: 0.0.40
codegen_flags: <defaults>
</compile_context>

<pallas_src>
import functools

import jax
import jax.numpy as jnp
from jax import lax
from jax.experimental import pallas as pl
from jax.experimental.pallas import tpu as pltpu


# ---------------------------------------------------------------------------
# Pallas kernel: one (batch b, layer i) grid step.
# ---------------------------------------------------------------------------
def wn_kernel(starts_ref, x_ref, w_in_ref, b_in_ref, w_rs_ref, b_rs_ref,
              o_ref, xpad_ref, *, kernel_size, pad):
    """
    starts_ref: SMEM (L*K,) int32 — tap start rows into xpad for (layer, tap)
    x_ref     : (T, Cp)      f32  — input block for batch b (read only at i==0)
    w_in_ref  : (K*Cp, 2*Cp) bf16 — fused dilated-conv weight of layer i
    b_in_ref  : (1, 2*Cp)    f32
    w_rs_ref  : (Cp, 2*Cp)   bf16 — 1x1 res/skip weight of layer i
    b_rs_ref  : (1, 2*Cp)    f32
    o_ref     : (T, Cp)      f32  — skip accumulator (VMEM-resident across layers)
    xpad_ref  : (T+2P, Cp)   f32  — residual stream with zero halo rows
    """
    i = pl.program_id(1)
    n_layers = pl.num_programs(1)
    T, Cp = x_ref.shape
    K = kernel_size
    P = pad

    @pl.when(i == 0)
    def _init():
        if P > 0:   # zero only the halo rows; the middle is overwritten below
            xpad_ref[0:P, :] = jnp.zeros((P, Cp), jnp.float32)
            xpad_ref[P + T:, :] = jnp.zeros((P, Cp), jnp.float32)
        xpad_ref[P:P + T, :] = x_ref[...]
        o_ref[...] = jnp.zeros_like(o_ref)

    # Fused dilated conv: gather the K shifted views of the residual stream
    # into one (T, K*Cp) operand and run a single wide bf16 MXU matmul.
    taps = [xpad_ref[pl.ds(starts_ref[i * K + k], T), :] for k in range(K)]
    xs = jnp.concatenate(taps, axis=-1).astype(jnp.bfloat16)        # (T, K*Cp)

    acc = jnp.dot(xs, w_in_ref[...],
                  preferred_element_type=jnp.float32) + b_in_ref[...]  # (T, 2Cp)

    # fused_add_tanh_sigmoid_multiply with g_l == 0 (f32 on VPU/EUP);
    # dropout(p=0.0) is the identity.
    acts = jnp.tanh(acc[:, :Cp]) * jax.nn.sigmoid(acc[:, Cp:])       # (T, Cp)

    # 1x1 res/skip conv as one MXU matmul (bf16 operands, f32 accumulate).
    rs = jnp.dot(acts.astype(jnp.bfloat16), w_rs_ref[...],
                 preferred_element_type=jnp.float32) + b_rs_ref[...]  # (T, 2Cp)

    @pl.when(i < n_layers - 1)       # last layer has no residual update
    def _residual():
        xpad_ref[P:P + T, :] = xpad_ref[P:P + T, :] + rs[:, :Cp]

    o_ref[...] = o_ref[...] + rs[:, Cp:]     # skip accumulate (f32)


def wn_forward_pallas(x_nct, w_in, b_in, w_rs, b_rs, starts,
                      *, kernel_size, max_pad, cp):
    """x_nct: (B, C, T) f32, PyTorch Conv1d layout. Returns (B, C, T) f32."""
    B, C, T = x_nct.shape
    L = w_in.shape[0]
    Cp, K, P = cp, kernel_size, max_pad

    # NCW -> NTC (channels on the lane axis), zero-pad channels to Cp.
    x_ntc = jnp.transpose(x_nct, (0, 2, 1))
    x_ntc = jnp.pad(x_ntc, ((0, 0), (0, 0), (0, Cp - C)))

    kernel = functools.partial(wn_kernel, kernel_size=K, pad=P)

    grid_spec = pltpu.PrefetchScalarGridSpec(
        num_scalar_prefetch=1,            # tap-start table lives in SMEM
        grid=(B, L),
        in_specs=[
            pl.BlockSpec((None, T, Cp), lambda b, i, s: (b, 0, 0)),        # x
            pl.BlockSpec((None, K * Cp, 2 * Cp), lambda b, i, s: (i, 0, 0)),  # w_in
            pl.BlockSpec((None, 1, 2 * Cp), lambda b, i, s: (i, 0, 0)),    # b_in
            pl.BlockSpec((None, Cp, 2 * Cp), lambda b, i, s: (i, 0, 0)),   # w_rs
            pl.BlockSpec((None, 1, 2 * Cp), lambda b, i, s: (i, 0, 0)),    # b_rs
        ],
        out_specs=pl.BlockSpec((None, T, Cp), lambda b, i, s: (b, 0, 0)),
        scratch_shapes=[pltpu.VMEM((T + 2 * P, Cp), jnp.float32)],  # padded residual
    )

    out_ntc = pl.pallas_call(
        kernel,
        out_shape=jax.ShapeDtypeStruct((B, T, Cp), jnp.float32),
        grid_spec=grid_spec,
        compiler_params=pltpu.CompilerParams(
            dimension_semantics=("parallel", "arbitrary"),
            vmem_limit_bytes=32 * 1024 * 1024),
    )(starts, x_ntc, w_in, b_in, w_rs, b_rs)

    # TODO(synk): for very long sequences also tile T (with dilated-conv halo
    # exchange per layer); here the per-batch residual (T, Cp) must fit VMEM.
    return jnp.transpose(out_ntc[:, :, :C], (0, 2, 1))   # back to (B, C, T)


# ---------------------------------------------------------------------------
# Parameter construction (weight-norm applied on the host / glue side).
# ---------------------------------------------------------------------------
def weight_norm_effective(v, g):
    # v: (C_out, C_in, K), g: (C_out,); norm over dims (1, 2) per out-channel.
    norm = jnp.sqrt(jnp.sum(v * v, axis=(1, 2), keepdims=True))
    return g[:, None, None] * v / norm


def make_params(key, hidden_dim, kernel_size, n_layers):
    """Per-layer effective (post weight-norm) params in PyTorch conv layout.

    Matmul weights are round-tripped through bf16 so the kernel's bf16 MXU path
    and the f32 reference use identical weight values.
    """
    C, K = hidden_dim, kernel_size
    keys = jax.random.split(key, 4 * n_layers)
    layers = []
    for i in range(n_layers):
        k0, k1, k2, k3 = keys[4 * i:4 * i + 4]

        v_in = jax.random.normal(k0, (2 * C, C, K), jnp.float32) * 0.1
        g_in = 1.0 + 0.05 * jax.random.normal(k1, (2 * C,), jnp.float32)
        w_in = weight_norm_effective(v_in, g_in)                     # (2C, C, K)
        b_in = 0.02 * jax.random.normal(k1, (2 * C,), jnp.float32)

        rs_out = 2 * C if i < n_layers - 1 else C
        v_rs = jax.random.normal(k2, (rs_out, C, 1), jnp.float32) * 0.1
        g_rs = 1.0 + 0.05 * jax.random.normal(k3, (rs_out,), jnp.float32)
        w_rs = weight_norm_effective(v_rs, g_rs)[:, :, 0]            # (rs_out, C)
        b_rs = 0.02 * jax.random.normal(k3, (rs_out,), jnp.float32)

        w_in = w_in.astype(jnp.bfloat16).astype(jnp.float32)
        w_rs = w_rs.astype(jnp.bfloat16).astype(jnp.float32)
        layers.append((w_in, b_in, w_rs, b_rs))
    return layers


def pack_params(layers, *, hidden_dim, kernel_size, dilation_rate, cp):
    """Pack per-layer params into lane-dense, layer-stacked kernel operands."""
    C, K, Cp = hidden_dim, kernel_size, cp
    L = len(layers)
    w_in_all, b_in_all, w_rs_all, b_rs_all = [], [], [], []
    for i, (w_in, b_in, w_rs, b_rs) in enumerate(layers):
        # Dilated conv weight -> fused (K*Cp, 2*Cp): row k*Cp + c <-> tap k, in-ch c;
        # tanh half in cols [0:C], sigmoid half in cols [Cp:Cp+C].
        w_kco = jnp.transpose(w_in, (2, 1, 0))                  # (K, C, 2C)
        wpad = jnp.zeros((K, Cp, 2 * Cp), jnp.float32)
        wpad = wpad.at[:, :C, :C].set(w_kco[:, :, :C])
        wpad = wpad.at[:, :C, Cp:Cp + C].set(w_kco[:, :, C:])
        w_in_all.append(wpad.reshape(K * Cp, 2 * Cp))

        bpad = jnp.zeros((2 * Cp,), jnp.float32)
        bpad = bpad.at[:C].set(b_in[:C]).at[Cp:Cp + C].set(b_in[C:])
        b_in_all.append(bpad)

        # 1x1 res/skip weight -> (Cp, 2*Cp): res half [0:C], skip half [Cp:Cp+C].
        wrs_t = jnp.transpose(w_rs)                             # (C, rs_out)
        wrs_pad = jnp.zeros((Cp, 2 * Cp), jnp.float32)
        brs_pad = jnp.zeros((2 * Cp,), jnp.float32)
        if i < L - 1:
            wrs_pad = wrs_pad.at[:C, :C].set(wrs_t[:, :C])
            wrs_pad = wrs_pad.at[:C, Cp:Cp + C].set(wrs_t[:, C:])
            brs_pad = brs_pad.at[:C].set(b_rs[:C]).at[Cp:Cp + C].set(b_rs[C:])
        else:
            # last layer: skip-only; res half stays zero and the kernel skips
            # the residual update for this layer anyway.
            wrs_pad = wrs_pad.at[:C, Cp:Cp + C].set(wrs_t)
            brs_pad = brs_pad.at[Cp:Cp + C].set(b_rs)
        w_rs_all.append(wrs_pad)
        b_rs_all.append(brs_pad)

    w_in_s = jnp.stack(w_in_all).astype(jnp.bfloat16)           # (L, K*Cp, 2Cp)
    b_in_s = jnp.stack(b_in_all)[:, None, :]                    # (L, 1, 2Cp) f32
    w_rs_s = jnp.stack(w_rs_all).astype(jnp.bfloat16)           # (L, Cp, 2Cp)
    b_rs_s = jnp.stack(b_rs_all)[:, None, :]                    # (L, 1, 2Cp) f32

    # Per-(layer, tap) start rows into the max-padded residual scratch.
    P = (K - 1) // 2 * dilation_rate ** (L - 1)
    starts = []
    for i in range(L):
        d = dilation_rate ** i
        for k in range(K):
            starts.append(P + (k - (K - 1) // 2) * d)
    starts = jnp.asarray(starts, jnp.int32)                     # (L*K,)
    return w_in_s, b_in_s, w_rs_s, b_rs_s, starts, P


# ---------------------------------------------------------------------------
# Pure-JAX reference (lax.conv_general_dilated) matching the PyTorch forward.
# ---------------------------------------------------------------------------
def wn_forward_ref(x_nct, layers, *, kernel_size, dilation_rate):
    B, C, T = x_nct.shape
    n_layers = len(layers)
    x = x_nct
    output = jnp.zeros_like(x)
    for i, (w_in, b_in, w_rs, b_rs) in enumerate(layers):
        d = dilation_rate ** i
        pad = (kernel_size * d - d) // 2
        x_in = lax.conv_general_dilated(
            x, w_in, window_strides=(1,), padding=[(pad, pad)],
            rhs_dilation=(d,),
            dimension_numbers=('NCH', 'OIH', 'NCH')) + b_in[None, :, None]
        acts = jnp.tanh(x_in[:, :C, :]) * jax.nn.sigmoid(x_in[:, C:, :])
        rs = lax.conv_general_dilated(
            acts, w_rs[:, :, None], window_strides=(1,), padding=[(0, 0)],
            dimension_numbers=('NCH', 'OIH', 'NCH')) + b_rs[None, :, None]
        if i < n_layers - 1:
            x = x + rs[:, :C, :]
            output = output + rs[:, C:, :]
        else:
            output = output + rs
    return output


if __name__ == "__main__":
    # Small shapes consistent with the module: Conv1d input is (B, hidden_dim, T).
    B, HIDDEN, T = 2, 32, 16
    KERNEL_SIZE, DILATION_RATE, N_LAYERS = 3, 2, 3

    key = jax.random.PRNGKey(0)
    kx, kp = jax.random.split(key)
    x = jax.random.normal(kx, (B, HIDDEN, T), jnp.float32)

    layers = make_params(kp, HIDDEN, KERNEL_SIZE, N_LAYERS)

    CP = ((HIDDEN + 127) // 128) * 128        # lane-dense channel padding
    w_in, b_in, w_rs, b_rs, starts, max_pad = pack_params(
        layers, hidden_dim=HIDDEN, kernel_size=KERNEL_SIZE,
        dilation_rate=DILATION_RATE, cp=CP)

    out = wn_forward_pallas(x, w_in, b_in, w_rs, b_rs, starts,
                            kernel_size=KERNEL_SIZE, max_pad=max_pad, cp=CP)
    out = jax.block_until_ready(out)

    ref = wn_forward_ref(x, layers, kernel_size=KERNEL_SIZE,
                         dilation_rate=DILATION_RATE)

    assert out.shape == (B, HIDDEN, T)
    max_err = float(jnp.max(jnp.abs(out - ref)))
    # bf16 MXU operands -> loosened tolerance vs the f32 reference.
    assert jnp.allclose(out, ref, rtol=5e-2, atol=5e-2), max_err

    print("KERNEL_OK")
</pallas_src>

<mosaic_0001>
module attributes {stable_mosaic.version = 11 : i64} {
  func.func @wn_kernel(%arg0: i32, %arg1: i32, %arg2: memref<9xi32, #tpu.memory_space<smem>>, %arg3: memref<1x16x128xf32, #tpu.memory_space<vmem>>, %arg4: memref<1x384x256xbf16, #tpu.memory_space<vmem>>, %arg5: memref<1x1x256xf32, #tpu.memory_space<vmem>>, %arg6: memref<1x128x256xbf16, #tpu.memory_space<vmem>>, %arg7: memref<1x1x256xf32, #tpu.memory_space<vmem>>, %arg8: memref<1x16x128xf32, #tpu.memory_space<vmem>>, %arg9: memref<24x128xf32, #tpu.memory_space<vmem>>) attributes {dimension_semantics = [#tpu.dimension_semantics<parallel>, #tpu.dimension_semantics<arbitrary>], iteration_bounds = array<i64: 2, 3>, scalar_prefetch = 1 : i64, scratch_operands = 1 : i64, tpu.core_type = #tpu.core_type<tc>, window_params = [{transform_indices = @transform_0, window_bounds = array<i64: 1, 16, 128>}, {transform_indices = @transform_1, window_bounds = array<i64: 1, 384, 256>}, {transform_indices = @transform_2, window_bounds = array<i64: 1, 1, 256>}, {transform_indices = @transform_3, window_bounds = array<i64: 1, 128, 256>}, {transform_indices = @transform_4, window_bounds = array<i64: 1, 1, 256>}, {transform_indices = @transform_5, window_bounds = array<i64: 1, 16, 128>}]} {
    %c0_i32 = arith.constant 0 : i32
    %0 = arith.cmpi eq, %arg1, %c0_i32 : i32
    %1 = arith.extui %0 : i1 to i32
    %c0_i32_0 = arith.constant 0 : i32
    %2 = arith.cmpi ne, %1, %c0_i32_0 : i32
    scf.if %2 {
      %cst_28 = arith.constant 0.000000e+00 : f32
      %57 = vector.broadcast %cst_28 : f32 to vector<4x128xf32>
      %c0_29 = arith.constant 0 : index
      %c0_30 = arith.constant 0 : index
      %58 = vector.load %arg9[%c0_29, %c0_30] : memref<24x128xf32, #tpu.memory_space<vmem>>, vector<4x128xf32>
      tpu.vector_store %arg9[%c0_29, %c0_30], %57 {strides = array<i32>} : memref<24x128xf32, #tpu.memory_space<vmem>>, vector<4x128xf32>,
      %cst_31 = arith.constant 0.000000e+00 : f32
      %59 = vector.broadcast %cst_31 : f32 to vector<4x128xf32>
      %c20 = arith.constant 20 : index
      %c0_32 = arith.constant 0 : index
      %60 = vector.load %arg9[%c20, %c0_32] : memref<24x128xf32, #tpu.memory_space<vmem>>, vector<4x128xf32>
      tpu.vector_store %arg9[%c20, %c0_32], %59 {strides = array<i32>} : memref<24x128xf32, #tpu.memory_space<vmem>>, vector<4x128xf32>,
      %c0_33 = arith.constant 0 : index
      %c0_34 = arith.constant 0 : index
      %c0_35 = arith.constant 0 : index
      %61 = vector.load %arg3[%c0_33, %c0_34, %c0_35] : memref<1x16x128xf32, #tpu.memory_space<vmem>>, vector<1x16x128xf32>
      %62 = vector.shape_cast %61 : vector<1x16x128xf32> to vector<16x128xf32>
      %c4 = arith.constant 4 : index
      %c0_36 = arith.constant 0 : index
      %63 = vector.load %arg9[%c4, %c0_36] : memref<24x128xf32, #tpu.memory_space<vmem>>, vector<16x128xf32>
      tpu.vector_store %arg9[%c4, %c0_36], %62 {strides = array<i32>} : memref<24x128xf32, #tpu.memory_space<vmem>>, vector<16x128xf32>,
      %cst_37 = arith.constant 0.000000e+00 : f32
      %64 = vector.broadcast %cst_37 : f32 to vector<16x128xf32>
      %c0_38 = arith.constant 0 : index
      %c0_39 = arith.constant 0 : index
      %c0_40 = arith.constant 0 : index
      %65 = vector.load %arg8[%c0_38, %c0_39, %c0_40] : memref<1x16x128xf32, #tpu.memory_space<vmem>>, vector<1x16x128xf32>
      %66 = vector.shape_cast %65 : vector<1x16x128xf32> to vector<16x128xf32>
      %67 = vector.shape_cast %64 : vector<16x128xf32> to vector<1x16x128xf32>
      tpu.vector_store %arg8[%c0_38, %c0_39, %c0_40], %67 {strides = array<i32>} : memref<1x16x128xf32, #tpu.memory_space<vmem>>, vector<1x16x128xf32>,
    } else {
    }
    %c3_i32 = arith.constant 3 : i32
    %3 = arith.muli %arg1, %c3_i32 : i32
    %c0_i32_1 = arith.constant 0 : i32
    %4 = arith.addi %3, %c0_i32_1 : i32
    %5 = arith.index_cast %4 : i32 to index
    %6 = memref.load %arg2[%5] : memref<9xi32, #tpu.memory_space<smem>>
    %7 = arith.index_cast %6 : i32 to index
    %c0 = arith.constant 0 : index
    %8 = vector.load %arg9[%7, %c0] : memref<24x128xf32, #tpu.memory_space<vmem>>, vector<16x128xf32>
    %c3_i32_2 = arith.constant 3 : i32
    %9 = arith.muli %arg1, %c3_i32_2 : i32
    %c1_i32 = arith.constant 1 : i32
    %10 = arith.addi %9, %c1_i32 : i32
    %11 = arith.index_cast %10 : i32 to index
    %12 = memref.load %arg2[%11] : memref<9xi32, #tpu.memory_space<smem>>
    %13 = arith.index_cast %12 : i32 to index
    %c0_3 = arith.constant 0 : index
    %14 = vector.load %arg9[%13, %c0_3] : memref<24x128xf32, #tpu.memory_space<vmem>>, vector<16x128xf32>
    %c3_i32_4 = arith.constant 3 : i32
    %15 = arith.muli %arg1, %c3_i32_4 : i32
    %c2_i32 = arith.constant 2 : i32
    %16 = arith.addi %15, %c2_i32 : i32
    %17 = arith.index_cast %16 : i32 to index
    %18 = memref.load %arg2[%17] : memref<9xi32, #tpu.memory_space<smem>>
    %19 = arith.index_cast %18 : i32 to index
    %c0_5 = arith.constant 0 : index
    %20 = vector.load %arg9[%19, %c0_5] : memref<24x128xf32, #tpu.memory_space<vmem>>, vector<16x128xf32>
    %21 = tpu.concatenate %8, %14, %20 in 1 : vector<16x128xf32>, vector<16x128xf32>, vector<16x128xf32> -> vector<16x384xf32>
    %22 = arith.truncf %21 : vector<16x384xf32> to vector<16x384xbf16>
    %c0_6 = arith.constant 0 : index
    %c0_7 = arith.constant 0 : index
    %c0_8 = arith.constant 0 : index
    %23 = vector.load %arg4[%c0_6, %c0_7, %c0_8] : memref<1x384x256xbf16, #tpu.memory_space<vmem>>, vector<1x384x256xbf16>
    %24 = vector.shape_cast %23 : vector<1x384x256xbf16> to vector<384x256xbf16>
    %cst = arith.constant dense<0.000000e+00> : vector<16x256xf32>
    %25 = tpu.matmul %22, %24, %cst {dimension_numbers = #tpu.dot_dimension_numbers<[1], [0], [0], [1], [0, 0, 1, 1], [], []>} : vector<16x384xbf16>, vector<384x256xbf16>, vector<16x256xf32> -> vector<16x256xf32>
    %c0_9 = arith.constant 0 : index
    %c0_10 = arith.constant 0 : index
    %c0_11 = arith.constant 0 : index
    %26 = vector.load %arg5[%c0_9, %c0_10, %c0_11] : memref<1x1x256xf32, #tpu.memory_space<vmem>>, vector<1x1x256xf32>
    %27 = vector.shape_cast %26 : vector<1x1x256xf32> to vector<1x256xf32>
    %28 = vector.broadcast %27 : vector<1x256xf32> to vector<16x256xf32>
    %29 = arith.addf %25, %28 : vector<16x256xf32>
    %30 = vector.extract_strided_slice %29 {offsets = [0, 0], sizes = [16, 128], strides = [1, 1]} : vector<16x256xf32> to vector<16x128xf32>
    %31 = math.tanh %30 : vector<16x128xf32>
    %32 = vector.extract_strided_slice %29 {offsets = [0, 128], sizes = [16, 128], strides = [1, 1]} : vector<16x256xf32> to vector<16x128xf32>
    %33 = arith.negf %32 : vector<16x128xf32>
    %34 = math.exp %33 : vector<16x128xf32>
    %cst_12 = arith.constant 1.000000e+00 : f32
    %35 = vector.broadcast %cst_12 : f32 to vector<16x128xf32>
    %36 = arith.addf %35, %34 : vector<16x128xf32>
    %37 = arith.divf %35, %36 : vector<16x128xf32>
    %38 = arith.mulf %31, %37 : vector<16x128xf32>
    %39 = arith.truncf %38 : vector<16x128xf32> to vector<16x128xbf16>
    %c0_13 = arith.constant 0 : index
    %c0_14 = arith.constant 0 : index
    %c0_15 = arith.constant 0 : index
    %40 = vector.load %arg6[%c0_13, %c0_14, %c0_15] : memref<1x128x256xbf16, #tpu.memory_space<vmem>>, vector<1x128x256xbf16>
    %41 = vector.shape_cast %40 : vector<1x128x256xbf16> to vector<128x256xbf16>
    %cst_16 = arith.constant dense<0.000000e+00> : vector<16x256xf32>
    %42 = tpu.matmul %39, %41, %cst_16 {dimension_numbers = #tpu.dot_dimension_numbers<[1], [0], [0], [1], [0, 0, 1, 1], [], []>} : vector<16x128xbf16>, vector<128x256xbf16>, vector<16x256xf32> -> vector<16x256xf32>
    %c0_17 = arith.constant 0 : index
    %c0_18 = arith.constant 0 : index
    %c0_19 = arith.constant 0 : index
    %43 = vector.load %arg7[%c0_17, %c0_18, %c0_19] : memref<1x1x256xf32, #tpu.memory_space<vmem>>, vector<1x1x256xf32>
    %44 = vector.shape_cast %43 : vector<1x1x256xf32> to vector<1x256xf32>
    %45 = vector.broadcast %44 : vector<1x256xf32> to vector<16x256xf32>
    %46 = arith.addf %42, %45 : vector<16x256xf32>
    %c2_i32_20 = arith.constant 2 : i32
    %47 = arith.cmpi slt, %arg1, %c2_i32_20 : i32
    %48 = arith.extui %47 : i1 to i32
    %c0_i32_21 = arith.constant 0 : i32
    %49 = arith.cmpi ne, %48, %c0_i32_21 : i32
    scf.if %49 {
      %c4 = arith.constant 4 : index
      %c0_28 = arith.constant 0 : index
      %57 = vector.load %arg9[%c4, %c0_28] : memref<24x128xf32, #tpu.memory_space<vmem>>, vector<16x128xf32>
      %58 = vector.extract_strided_slice %46 {offsets = [0, 0], sizes = [16, 128], strides = [1, 1]} : vector<16x256xf32> to vector<16x128xf32>
      %59 = arith.addf %57, %58 : vector<16x128xf32>
      %c4_29 = arith.constant 4 : index
      %c0_30 = arith.constant 0 : index
      %60 = vector.load %arg9[%c4_29, %c0_30] : memref<24x128xf32, #tpu.memory_space<vmem>>, vector<16x128xf32>
      tpu.vector_store %arg9[%c4_29, %c0_30], %59 {strides = array<i32>} : memref<24x128xf32, #tpu.memory_space<vmem>>, vector<16x128xf32>,
    } else {
    }
    %c0_22 = arith.constant 0 : index
    %c0_23 = arith.constant 0 : index
    %c0_24 = arith.constant 0 : index
    %50 = vector.load %arg8[%c0_22, %c0_23, %c0_24] : memref<1x16x128xf32, #tpu.memory_space<vmem>>, vector<1x16x128xf32>
    %51 = vector.shape_cast %50 : vector<1x16x128xf32> to vector<16x128xf32>
    %52 = vector.extract_strided_slice %46 {offsets = [0, 128], sizes = [16, 128], strides = [1, 1]} : vector<16x256xf32> to vector<16x128xf32>
    %53 = arith.addf %51, %52 : vector<16x128xf32>
    %c0_25 = arith.constant 0 : index
    %c0_26 = arith.constant 0 : index
    %c0_27 = arith.constant 0 : index
    %54 = vector.load %arg8[%c0_25, %c0_26, %c0_27] : memref<1x16x128xf32, #tpu.memory_space<vmem>>, vector<1x16x128xf32>
    %55 = vector.shape_cast %54 : vector<1x16x128xf32> to vector<16x128xf32>
    %56 = vector.shape_cast %53 : vector<16x128xf32> to vector<1x16x128xf32>
    tpu.vector_store %arg8[%c0_25, %c0_26, %c0_27], %56 {strides = array<i32>} : memref<1x16x128xf32, #tpu.memory_space<vmem>>, vector<1x16x128xf32>,
    return
  }
  func.func @transform_0(%arg0: i32, %arg1: i32, %arg2: memref<9xi32, #tpu.memory_space<smem>>) -> (i32, i32, i32) {
    %c0_i32 = arith.constant 0 : i32
    %c0_i32_0 = arith.constant 0 : i32
    %c0_i32_1 = arith.constant 0 : i32
    return %arg0, %c0_i32, %c0_i32_0 : i32, i32, i32
  }
  func.func @transform_1(%arg0: i32, %arg1: i32, %arg2: memref<9xi32, #tpu.memory_space<smem>>) -> (i32, i32, i32) {
    %c0_i32 = arith.constant 0 : i32
    %c0_i32_0 = arith.constant 0 : i32
    %c0_i32_1 = arith.constant 0 : i32
    return %arg1, %c0_i32, %c0_i32_0 : i32, i32, i32
  }
  func.func @transform_2(%arg0: i32, %arg1: i32, %arg2: memref<9xi32, #tpu.memory_space<smem>>) -> (i32, i32, i32) {
    %c0_i32 = arith.constant 0 : i32
    %c0_i32_0 = arith.constant 0 : i32
    %c0_i32_1 = arith.constant 0 : i32
    return %arg1, %c0_i32, %c0_i32_0 : i32, i32, i32
  }
  func.func @transform_3(%arg0: i32, %arg1: i32, %arg2: memref<9xi32, #tpu.memory_space<smem>>) -> (i32, i32, i32) {
    %c0_i32 = arith.constant 0 : i32
    %c0_i32_0 = arith.constant 0 : i32
    %c0_i32_1 = arith.constant 0 : i32
    return %arg1, %c0_i32, %c0_i32_0 : i32, i32, i32
  }
  func.func @transform_4(%arg0: i32, %arg1: i32, %arg2: memref<9xi32, #tpu.memory_space<smem>>) -> (i32, i32, i32) {
    %c0_i32 = arith.constant 0 : i32
    %c0_i32_0 = arith.constant 0 : i32
    %c0_i32_1 = arith.constant 0 : i32
    return %arg1, %c0_i32, %c0_i32_0 : i32, i32, i32
  }
  func.func @transform_5(%arg0: i32, %arg1: i32, %arg2: memref<9xi32, #tpu.memory_space<smem>>) -> (i32, i32, i32) {
    %c0_i32 = arith.constant 0 : i32
    %c0_i32_0 = arith.constant 0 : i32
    %c0_i32_1 = arith.constant 0 : i32
    return %arg0, %c0_i32, %c0_i32_0 : i32, i32, i32
  }
}

</mosaic_0001>

<bundles_post_ra>
// kernel: tpu_custom_call.1
= control target key start
LH: loop header
LB: loop body
LE: loop exit
PB: predicated region body
PF: predicated region fallthrough
CT: control target
= control target key end

     0   :  { %s1756_s21 = smov [#allocation4]   ;;  %s2218_s0 = inlined_call_operand.hbm [shape: s32[9], index: 0, kind: input, shape index: {}]   ;;  %s2219_s1 = inlined_call_operand.hbm [shape: f32[2,16,128], index: 1, kind: input, shape index: {}]   ;;  %s2220_s2 = inlined_call_operand.hbm [shape: bf16[3,384,256], index: 2, kind: input, shape index: {}]   ;;  %s2221_s3 = inlined_call_operand.hbm [shape: f32[3,1,256], index: 3, kind: input, shape index: {}]   ;;  %s2222_s4 = inlined_call_operand.hbm [shape: bf16[3,128,256], index: 4, kind: input, shape index: {}]   ;;  %s2223_s5 = inlined_call_operand.vmem [shape: f32[3,1,256], index: 5, kind: input, shape index: {}]   ;;  %s2224_s6 = inlined_call_operand.hbm [shape: f32[2,16,128], index: 6, kind: output, shape index: {}]  }
   0x1   :  { %2243 = sst [smem:[#allocation29_spill]] %s2219_s1 }
   0x2   :  { %2244 = sst [smem:[#allocation30_spill]] %s2220_s2 }
   0x3   :  { %2245 = sst [smem:[#allocation31_spill]] %s2223_s5 }
   0x4   :  { %2246 = sst [smem:[#allocation32_spill]] %s2224_s6 }
   0x5   :  { %12 = dma.hbm_to_smem %s2218_s0, 16, %s1756_s21, [#allocation3] }
   0x6   :  { %1694 = dma.done.wait [#allocation3], 16 }
   0x7   :  { %1695 = vsyncadd [#allocation3], 4294967280 }
   0x8   :  { %14 = sfence }
   0x9   :  { %15 = vsyncpa [#allocation6], 0 }
   0xa   :  { %17 = vsyncpa [#allocation6 + $0x1], 0 }
   0xb   :  { %18 = vsyncpa [#allocation9], 0 }
   0xc   :  { %20 = vsyncpa [#allocation9 + $0x1], 0 }
   0xd   :  { %21 = vsyncpa [#allocation12], 0 }
   0xe   :  { %23 = vsyncpa [#allocation12 + $0x1], 0 }
   0xf   :  { %24 = vsyncpa [#allocation7], 0 }
  0x10   :  { %26 = vsyncpa [#allocation7 + $0x1], 0  ;;  %s1806_s24 = smov 0   ;;  %s1808_s25 = smov 0  }
  0x11   :  { %s1810_s26 = smov 0   ;;  %s1812_s27 = smov 0  }
  0x12   :  { %s1814_s0 = smov 0   ;;  %s1816_s28 = smov 0  }
  0x13   :  { %s1818_s29 = smov 0   ;;  %s1820_s30 = smov 0  }
  0x14   :  { %s1822_s7 = smov 0   ;;  %s1824_s8 = smov 0  }
  0x15   :  { %s1826_s9 = smov 0  }
  0x16 LB: > { %2247 = sst [smem:[#allocation19_spill]] %s1718_s25  ;;  %p59_p0 = scmp.eq.s32.totalorder %s1754_s9, 0  ;;  %s1754_s9 = sphi %s1826_s9, %s32_s9   ;;  %s1750_s8 = sphi %s1824_s8, %s2296_s8   ;;  %s1746_s7 = sphi %s1822_s7, %s2295_s7   ;;  %s1742_s30 = sphi %s1820_s30, %s2287_s30   ;;  %s1738_s29 = sphi %s1818_s29, %s2294_s29   ;;  %s1734_s28 = sphi %s1816_s28, %s2286_s28   ;;  %s1730_s0 = sphi %s1814_s0, %s2293_s0   ;;  %s1726_s27 = sphi %s1812_s27, %s2292_s27   ;;  %s1722_s26 = sphi %s1810_s26, %s2291_s26   ;;  %s1718_s25 = sphi %s1808_s25, %s2290_s25   ;;  %s1714_s24 = sphi %s1806_s24, %s2284_s24  }
  0x17   : > { %2248 = sst [smem:[#allocation20_spill]] %s1734_s28  ;;  %p84_p1 = scmp.ne.s32.totalorder %s1722_s26, %s1718_s25 }
  0x18   : > { %2249 = sst [smem:[#allocation21_spill]] %s1738_s29  ;;  %p90_p2 = scmp.ne.s32.totalorder %s1718_s25, %s1714_s24 }
  0x19   : > { %2250 = sst [smem:[#allocation22_spill]] %s1742_s30  ;;  %p86_p3 = por %p84_p1, %p59_p0 }
  0x1a   : > { %2251 = sst [smem:[#allocation23_spill]] %s1750_s8  ;;  %p2232_p4 = scmp.lt.s32.totalorder %s1754_s9, 6 }
  0x1b   : > { %s239_s12 = sand.u32 1, %s1754_s9   ;;  %s1873_s13 = sand.u32 1, %s1722_s26  }
  0x1c   : > { %s1269_s14 = smul.u32 384, %s1873_s13  ;;  %p1879_p5 = pnand %p2232_p4, %p86_p3 }
  0x1d   : > { %s1270_s15 = smul.u32 6144, %s1746_s7  ;;  %p1186_p6 = scmp.ge.s32.totalorder %s1754_s9, 1 }
  0x1e   : > { %s2253_s2 = sld [smem:[#allocation30_spill]]  ;;  %s243_s20 = scalar_lea.vmem [#allocation8], %s1269_s14 }
  0x1f   : > { %s250_s21 = sshll.u32 %s243_s20, 4  ;;  %s1887_s22 = scalar_lea.sflag [#allocation9], %s239_s12  ;;  %s251_s21 = int_to_ptr.vmem [resolvable:$true] %s250_s21 }
  0x20   : > { %p2228_p7 = pneg %p1879_p5  ;;  %s1525_s23 = scalar_lea.vmem %s251_s21, 6144 }
  0x21   : > { %p1526_p8 = scmp.ne.s32.totalorder %s251_s21, %s1525_s23  ;;  %s1757_s11 = smov [#allocation8]  }
  0x22   : > { %s1530_s10 = sshll.u32 %s1757_s11, 4  ;;  %s1531_s10 = int_to_ptr.vmem [resolvable:$false] %s1530_s10 }
  0x23   : > { %p1528_p9 = pnand %p1526_p8, %p2228_p7  ;;  %s1532_s6 = scalar_lea.vmem %s1531_s10, 12288 }
  0x24   : > { %s249_s19 = scalar_lea.hbm %s2253_s2, %s1270_s15  ;;  %p1533_p11 = scmp.lt.s32.totalorder %s251_s21, %s1531_s10 }
  0x25   : > { %p1529_p10 = pneg %p1528_p9  ;;  %p1534_p12 = scmp.lt.s32.totalorder %s1532_s6, %s1525_s23 }
  0x27   : > { %p1535_p13 = por %p1534_p12, %p1533_p11 }
  0x29   : > { %p1536_p1 = pnand %p1535_p13, %p1529_p10 }
  0x2b   : > { %1539 = shalt.err (!%p1536_p1)
}
  0x2c   : > { %s2226_s14 = smov 128   ;;  %s2229_s6 = smov 8  }
  0x2d   : > { %1288 = dma.hbm_to_vmem [thread:$0]  (!%p1879_p5), %s249_s19, 6144, %s251_s21, %s1887_s22, %s2226_s14, %s2226_s14, %s2229_s6  }
  0x2e   : > { %p305_p3 = scmp.lt.s32.totalorder %s1754_s9, 7  ;;  %s1908_s11 = sadd.s32 4294967295, %s1754_s9  }
  0x2f   : > { %s1173_s12 = sadd.s32 4294967294, %s1754_s9   ;;  %s2255_s15 = sadd.s32 1, %s1746_s7 }
  0x30   : > { %p1903_p8 = pnand %p1186_p6, %p305_p3  ;;  %p42_p9 = scmp.ge.s32.totalorder %s2255_s15, 3 }
  0x31   : > { %s44_s17 = sadd.s32 1, %s1750_s8  ;;  %s51_s18 = sadd.s32 1, %s1734_s28 }
  0x32   : > { %p58_p6 = scmp.ne.s32.totalorder %s1734_s28, %s1730_s0  ;;  %s2256_s19 = smov %s2255_s15 }
  0x33   : > { %s2298_s19 = smov (%p42_p9, %s2256_s19), 0  ;;  %s2300_s17 = smov (!%p42_p9, %s44_s17), %s1750_s8 }
  0x34   : > { %2257 = sst [smem:[#allocation24_spill]] %s2298_s19  ;;  %p1927_p10 = por %p59_p0, %p58_p6 }
  0x35   : > { %p64_p11 = scmp.ne.s32.totalorder %s1730_s0, %s1726_s27  ;;  %p46_p12 = scmp.ge.s32.totalorder %s2300_s17, 2 }
  0x36   : > { %p65_p13 = scmp.eq.s32.totalorder %s1908_s11, 0  ;;  %s74_s21 = ssub.s32 %s1746_s7, %s2298_s19 }
  0x37   : > { %p192_p1 = scmp.eq.s32.totalorder %s1908_s11, 5  ;;  %s2302_s17 = smov (%p46_p12, %s2300_s17), 0 }
  0x38   : > { %2259 = sst [smem:[#allocation25_spill]] %s2302_s17  ;;  %p1942_p3 = por %p65_p13, %p64_p11 }
  0x39   : > { %p75_p0 = scmp.eq.s32.totalorder %s74_s21, 0  ;;  %s48_s15 = ssub.s32 %s1750_s8, %s2302_s17 }
  0x3a   : > { %p1951_p9 = por %p90_p2, %p65_p13  ;;  %p49_p7 = scmp.eq.s32.totalorder %s48_s15, 0 }
  0x3b   : > { %p1958_p12 = por %p192_p1, %p58_p6  ;;  %s2265_s2 = sadd.s32 1, %s1722_s26 }
  0x3c   : > { %s2261_s14 = scalar_select %p1951_p9, 1, 0 }
  0x3d   : > { %s2263_s6 = scalar_select %p1958_p12, 1, 0 }
  0x3e   : > { %2262 = sst [smem:[#allocation26_spill]] %s2261_s14  ;;  %p198_p4 = scmp.eq.s32.totalorder %s1173_s12, 5 }
  0x3f   : > { %2264 = sst [smem:[#allocation27_spill]] %s2263_s6  ;;  %s218_s17 = sand.u32 1, %s1734_s28  }
  0x40   : > { %s1965_s19 = scalar_select %p75_p0, %s1722_s26, %s2265_s2  }
  0x41   : > { %s1968_s21 = scalar_select %p49_p7, %s1734_s28, %s51_s18  }
  0x42   : > { %s1176_s24 = sshll.u32 %s218_s17, 4  ;;  %p1974_p2 = por %p198_p4, %p64_p11 }
  0x43   : > { %2266 = sst [smem:[#allocation28_spill]] %s1968_s21  ;;  %s1265_s5 = sshll.u32 %s1750_s8, 8 }
  0x44   : > { %s2267_s30 = scalar_select %p1974_p2, 1, 0 }
  0x45   : > { %s222_s15 = scalar_lea.vmem [#allocation5], %s1176_s24  ;;  %s2268_s1 = sld [smem:[#allocation29_spill]] }
  0x46   : > { %s229_s29 = sshll.u32 %s222_s15, 4  ;;  %p2269_p6 = scmp.lt.s32.totalorder %s1754_s9, 6  ;;  %s230_s29 = int_to_ptr.vmem [resolvable:$true] %s229_s29 }
  0x47   : > { %s1180_s12 = sshll.u32 %s1873_s13, 1  ;;  %s1266_s18 = sshll.u32 %s1746_s7, 5 }
  0x48   : > { %p1986_p7 = pnand %p2269_p6, %p1927_p10  ;;  %s1995_s8 = scalar_lea.hbm %s2221_s3, %s1266_s18 }
  0x49   : > { %s219_s24 = scalar_lea.sflag [#allocation6], %s218_s17  ;;  %s1553_s25 = scalar_lea.vmem %s230_s29, 256 }
  0x4a   : > { %p1542_p4 = pneg %p1986_p7  ;;  %p1554_p11 = scmp.ne.s32.totalorder %s230_s29, %s1553_s25 }
  0x4b   : > { %s228_s6 = scalar_lea.hbm %s2268_s1, %s1265_s5  ;;  %s1760_s5 = smov [#allocation5]  }
  0x4c   : > { %p1556_p13 = pnand %p1554_p11, %p1542_p4  ;;  %s1558_s14 = sshll.u32 %s1760_s5, 4  ;;  %s1559_s14 = int_to_ptr.vmem [resolvable:$false] %s1558_s14 }
  0x4d   : > { %s1560_s20 = scalar_lea.vmem %s1559_s14, 512  ;;  %p1561_p10 = scmp.lt.s32.totalorder %s230_s29, %s1559_s14 }
  0x4e   : > { %p1557_p1 = pneg %p1556_p13  ;;  %p1562_p0 = scmp.lt.s32.totalorder %s1560_s20, %s1553_s25 }
  0x50   : > { %p1563_p6 = por %p1562_p0, %p1561_p10 }
  0x52   : > { %p1564_p2 = pnand %p1563_p6, %p1557_p1 }
  0x54   : > { %1567 = shalt.err (!%p1564_p2)
}
  0x55   : > { %s2271_s28 = smov 8   ;;  %s2272_s21 = smov 128  }
  0x56   : > { %1285 = dma.hbm_to_vmem [thread:$0]  (!%p1986_p7), %s228_s6, 256, %s230_s29, %s219_s24, %s2272_s21, %s2272_s21, %s2271_s28  }
  0x57   : > { %s264_s17 = scalar_lea.vmem [#allocation10], %s1180_s12  ;;  %s1183_s18 = sshll.u32 %s1873_s13, 7 }
  0x58   : > { %s272_s15 = sshll.u32 %s264_s17, 4  ;;  %p2273_p11 = pneg %p1879_p5  ;;  %s273_s15 = int_to_ptr.vmem [resolvable:$true] %s272_s15 }
  0x59   : > { %s1581_s5 = scalar_lea.vmem %s273_s15, 32  ;;  %s1761_s25 = smov [#allocation10]  }
  0x5a   : > { %p1582_p4 = scmp.ne.s32.totalorder %s273_s15, %s1581_s5  ;;  %s1586_s14 = sshll.u32 %s1761_s25, 4  ;;  %s1587_s14 = int_to_ptr.vmem [resolvable:$false] %s1586_s14 }
  0x5b   : > { %s1588_s2 = scalar_lea.vmem %s1587_s14, 64  ;;  %p1589_p2 = scmp.lt.s32.totalorder %s273_s15, %s1587_s14 }
  0x5c   : > { %p1584_p13 = pnand %p1582_p4, %p2273_p11  ;;  %p1590_p1 = scmp.lt.s32.totalorder %s1588_s2, %s1581_s5 }
  0x5e   : > { %p1585_p10 = pneg %p1584_p13  ;;  %p1591_p0 = por %p1590_p1, %p1589_p2 }
  0x60   : > { %p1592_p6 = pnand %p1591_p0, %p1585_p10 }
  0x62   : > { %1595 = shalt.err (!%p1592_p6)
}
  0x63   : > { %1291 = dma.hbm_to_vmem [thread:$0]  (!%p1879_p5), %s1995_s8, 32, %s273_s15, %s1887_s22  }
  0x64   : > { %s1267_s29 = sshll.u32 %s1746_s7, 11  ;;  %s283_s20 = scalar_lea.vmem [#allocation11], %s1183_s18 }
  0x65   : > { %s289_s24 = scalar_lea.hbm %s2222_s4, %s1267_s29  ;;  %s290_s17 = sshll.u32 %s283_s20, 4  ;;  %s291_s17 = int_to_ptr.vmem [resolvable:$true] %s290_s17 }
  0x66   : > { %s280_s5 = scalar_lea.sflag [#allocation12], %s1873_s13  ;;  %s1609_s25 = scalar_lea.vmem %s291_s17, 2048 }
  0x67   : > { %p1610_p7 = scmp.ne.s32.totalorder %s291_s17, %s1609_s25  ;;  %p2274_p4 = pmov %p2273_p11 }
  0x68   : > { %s1762_s14 = smov [#allocation11]  }
  0x69   : > { %p1612_p11 = pnand %p1610_p7, %p2274_p4  ;;  %s1614_s2 = sshll.u32 %s1762_s14, 4  ;;  %s1615_s2 = int_to_ptr.vmem [resolvable:$false] %s1614_s2 }
  0x6a   : > { %s1616_s1 = scalar_lea.vmem %s1615_s2, 4096  ;;  %p1617_p10 = scmp.lt.s32.totalorder %s291_s17, %s1615_s2 }
  0x6b   : > { %p1613_p13 = pneg %p1612_p11  ;;  %p1618_p2 = scmp.lt.s32.totalorder %s1616_s1, %s1609_s25 }
  0x6d   : > { %p1619_p1 = por %p1618_p2, %p1617_p10 }
  0x6f   : > { %p1620_p0 = pnand %p1619_p1, %p1613_p13 }
  0x71   : > { %1623 = shalt.err (!%p1620_p0)
}
  0x72   : > { %1294 = dma.hbm_to_vmem [thread:$0]  (!%p1879_p5), %s289_s24, 2048, %s291_s17, %s280_s5, %s2272_s21, %s2272_s21, %s2271_s28  }
  0x73   : > { %309 = sbr.rel (%p1903_p8) target bundleno = 687 (0x2af), region = 40  ;;  %s2028_s8 = sand.u32 (!%p1903_p8), 1, %s1730_s0  }
  0x74   : > { %s1187_s13 = sshll.u32 (!%p1903_p8), %s2028_s8, 4  ;;  %s312_s1 = scalar_lea.sflag (!%p1903_p8), [#allocation6], %s2028_s8 }
  0x75   : > { %s315_s22 = scalar_lea.vmem (!%p1903_p8), [#allocation5], %s1187_s13 }
  0x78   : > { %1697 = dma.done.wait (%p1942_p3), %s312_s1, 256  }
  0x79   : > { %1699 = vsyncadd (%p1942_p3), %s312_s1, 4294967040  ;;  %s2275_s16 = sld [smem:[#allocation19_spill]]  ;;  %s320_s21 = sand.u32 1, %s1908_s11  }
  0x7a   : > { %s321_s18 = scalar_lea.sflag [#allocation9], %s320_s21 }
  0x7f   : > { %s322_s10 = sand.u32 1, %s2275_s16  }
  0x80   : > { %s1271_s15 = smul.u32 384, %s322_s10 }
  0x82   : > { %s2038_s29 = scalar_lea.vmem [#allocation8], %s1271_s15 }
  0x83   : > { %1701 = dma.done.wait (%p1951_p9), %s321_s18, 6176  }
  0x84   : > { %1703 = vsyncadd (%p1951_p9), %s321_s18, 4294961120  ;;  %s1188_s6 = sshll.u32 %s322_s10, 1  ;;  %s1189_s12 = sshll.u32 %s322_s10, 7 }
  0x85   : > { %s2044_s24 = scalar_lea.vmem [#allocation10], %s1188_s6  ;;  %s339_s23 = scalar_lea.sflag [#allocation12], %s322_s10 }
  0x86   : > { %s2046_s20 = scalar_lea.vmem [#allocation11], %s1189_s12 }
  0x87   : > { %1705 = dma.done.wait (%p1951_p9), %s339_s23, 2048  }
  0x88   : > { %1707 = vsyncadd (%p1951_p9), %s339_s23, 4294965248  ;;  %s2277_s11 = sld [smem:[#allocation21_spill]]  ;;  %s2059_s16 = scalar_lea.vmem [#allocation13], %s1187_s13 }
  0x89   : > { %s2278_s2 = sld [smem:[#allocation31_spill]] }
  0x8e   : > { %p388_p5 = scmp.lt.s32.totalorder %s2277_s11, 2  ;;  %p1192_p8 = scmp.ne.s32.totalorder %s2277_s11, 0 }
  0x90   : > { %s389_s17 = scalar_select %p388_p5, %s2277_s11, 2 }
  0x91   : > { %396 = sbr.rel (%p1192_p8) target bundleno = 154 (0x9a), region = 60 }
  0x92   : > { %s1191_s5 = sshll.u32 %s389_s17, 1 }
  0x93   : > { %s2057_s1 = scalar_lea.vmem %s2278_s2, %s1191_s5 }
  0x96   : > { %v399_v0 = vld [vmem:[%s315_s22] sm:$0xff]  ;;  %v400_v1 = vld [vmem:[%s315_s22 + $0x8] sm:$0xff]  ;;  %v1763_v2 = vmov 0.0  }
  0x97   : > { %397 = vst [vmem:[#allocation2] sm:$0xf] %v1763_v2  ;;  %398 = vst [vmem:[#allocation2 + $0x14] sm:$0xf] %v1763_v2 }
  0x98   : > { %403 = vst [vmem:[%s2059_s16] sm:$0xff] %v1763_v2  ;;  %404 = vst [vmem:[%s2059_s16 + $0x8] sm:$0xff] %v1763_v2 }
  0x99   : > { %401 = vst [vmem:[#allocation2 + $0x4] sm:$0xff] %v399_v0  ;;  %402 = vst [vmem:[#allocation2 + $0xc] sm:$0xff] %v400_v1 }
  0x9a PF: > { %v1396_v3 = vld [vmem:[%s2038_s29 + $0x74] ss:$8 sps:$4 sm:$0xff]   ;;  %v1398_v4 = vld [vmem:[%s2038_s29 + $0x70] ss:$8 sps:$4 sm:$0xff]   ;;  %v1764_v5 = vmov 0   ;;  %s2279_s13 = sld [smem:[#allocation21_spill]] }
  0x9b   : > { %798 = vmatprep.mubr.bf16.mxu1 %v1764_v5  ;;  %723 = vmatprep.subr.bf16.mxu0 %v1396_v3  ;;  %v1399_v6 = vld [vmem:[%s2038_s29 + $0x64] ss:$8 sps:$4 sm:$0xff]   ;;  %v1401_v7 = vld [vmem:[%s2038_s29 + $0x60] ss:$8 sps:$4 sm:$0xff]   ;;  %v1402_v8 = vld [vmem:[%s2038_s29 + $0x54] ss:$8 sps:$4 sm:$0xff]  }
  0x9c   : > { %724 = vmatpush1.bf16.msra.mxu0 %v1398_v4  ;;  %v1404_v9 = vld [vmem:[%s2038_s29 + $0x50] ss:$8 sps:$4 sm:$0xff]   ;;  %v1405_v10 = vld [vmem:[%s2038_s29 + $0x44] ss:$8 sps:$4 sm:$0xff]   ;;  %v1407_v11 = vld [vmem:[%s2038_s29 + $0x40] ss:$8 sps:$4 sm:$0xff]  }
  0x9d   : > { %725 = vmatprep.subr.bf16.mxu0 %v1399_v6  ;;  %v1419_v12 = vld [vmem:[%s2038_s29 + $0x174] ss:$8 sps:$4 sm:$0xff]   ;;  %v1422_v13 = vld [vmem:[%s2038_s29 + $0x170] ss:$8 sps:$4 sm:$0xff]   ;;  %v1425_v15 = vld [vmem:[%s2038_s29 + $0x164] ss:$8 sps:$4 sm:$0xff]  }
  0x9e   : > { %v1408_v14 = vld [vmem:[%s2038_s29 + $0x34] ss:$8 sps:$4 sm:$0xff]   ;;  %766 = vmatprep.subr.bf16.mxu1 %v1419_v12  ;;  %v1428_v16 = vld [vmem:[%s2038_s29 + $0x160] ss:$8 sps:$4 sm:$0xff]   ;;  %v1410_v17 = vld [vmem:[%s2038_s29 + $0x30] ss:$8 sps:$4 sm:$0xff]  }
  0x9f   : > { %767 = vmatpush1.bf16.msra.mxu1 %v1422_v13  ;;  %v1411_v18 = vld [vmem:[%s2038_s29 + $0x24] ss:$8 sps:$4 sm:$0xff]   ;;  %v1431_v19 = vld [vmem:[%s2038_s29 + $0x154] ss:$8 sps:$4 sm:$0xff]   ;;  %v1434_v20 = vld [vmem:[%s2038_s29 + $0x150] ss:$8 sps:$4 sm:$0xff]   ;;  %v473_v13 = vlaneseq }
  0xa0   : > { %726 = vmatpush1.bf16.msra.mxu0 %v1401_v7  ;;  %768 = vmatprep.subr.bf16.mxu1 %v1425_v15  ;;  %s2082_s22 = smul.u32 3, %s2279_s13  ;;  %v1413_v21 = vld [vmem:[%s2038_s29 + $0x20] ss:$8 sps:$4 sm:$0xff]   ;;  %v1437_v22 = vld [vmem:[%s2038_s29 + $0x144] ss:$8 sps:$4 sm:$0xff]   ;;  %p1259_p3 = scmp.ge.s32.totalorder %s2279_s13, 2 }
  0xa1   : > { %727 = vmatprep.subr.bf16.mxu0 %v1402_v8  ;;  %v1414_v23 = vld [vmem:[%s2038_s29 + $0x14] ss:$8 sps:$4 sm:$0xff]   ;;  %v1416_v24 = vld [vmem:[%s2038_s29 + $0x10] ss:$8 sps:$4 sm:$0xff]   ;;  %v1440_v25 = vld [vmem:[%s2038_s29 + $0x140] ss:$8 sps:$4 sm:$0xff]  }
  0xa2   : > { %s410_s28 = sadd.s32 1, %s2082_s22  ;;  %s415_s10 = sadd.s32 2, %s2082_s22  ;;  %v1443_v26 = vld [vmem:[%s2038_s29 + $0x134] ss:$8 sps:$4 sm:$0xff]   ;;  %v1417_v27 = vld [vmem:[%s2038_s29 + $0x4] ss:$8 sps:$4 sm:$0xff]  }
  0xa3   : > { %769 = vmatpush1.bf16.msra.mxu1 %v1428_v16  ;;  %s2089_s21 = sld [smem:[#allocation4 + %s410_s28]]  ;;  %v1446_v28 = vld [vmem:[%s2038_s29 + $0x130] ss:$8 sps:$4 sm:$0xff]   ;;  %v1421_v29 = vld [vmem:[%s2038_s29] ss:$8 sps:$4 sm:$0xff]  }
  0xa4   : > { %728 = vmatpush1.bf16.msra.mxu0 %v1404_v9  ;;  %770 = vmatprep.subr.bf16.mxu1 %v1431_v19  ;;  %s2096_s15 = sld [smem:[#allocation4 + %s415_s10]]  ;;  %v1449_v30 = vld [vmem:[%s2038_s29 + $0x124] ss:$8 sps:$4 sm:$0xff]   ;;  %v1423_v31 = vld [vmem:[%s2038_s29 + $0xf4] ss:$8 sps:$4 sm:$0xff]  }
  0xa5   : > { %729 = vmatprep.subr.bf16.mxu0 %v1405_v10  ;;  %v1452_v32 = vld [vmem:[%s2038_s29 + $0x120] ss:$8 sps:$4 sm:$0xff]   ;;  %v1427_v33 = vld [vmem:[%s2038_s29 + $0xf0] ss:$8 sps:$4 sm:$0xff]   ;;  %v1455_v34 = vld [vmem:[%s2038_s29 + $0x114] ss:$8 sps:$4 sm:$0xff]  }
  0xa6   : > { %v1429_v35 = vld [vmem:[%s2038_s29 + $0xe4] ss:$8 sps:$4 sm:$0xff]   ;;  %v1433_v37 = vld [vmem:[%s2038_s29 + $0xe0] ss:$8 sps:$4 sm:$0xff]   ;;  %v1458_v38 = vld [vmem:[%s2038_s29 + $0x110] ss:$8 sps:$4 sm:$0xff]  }
  0xa7   : > { %771 = vmatpush1.bf16.msra.mxu1 %v1434_v20  ;;  %v1461_v39 = vld [vmem:[%s2038_s29 + $0x104] ss:$8 sps:$4 sm:$0xff]   ;;  %v1435_v41 = vld [vmem:[%s2038_s29 + $0xd4] ss:$8 sps:$4 sm:$0xff]   ;;  %v1464_v43 = vld [vmem:[%s2038_s29 + $0x100] ss:$8 sps:$4 sm:$0xff]  }
  0xa8   : > { %730 = vmatpush1.bf16.msra.mxu0 %v1407_v11  ;;  %772 = vmatprep.subr.bf16.mxu1 %v1437_v22  ;;  %v1439_v46 = vld [vmem:[%s2038_s29 + $0xd0] ss:$8 sps:$4 sm:$0xff]   ;;  %v1441_v47 = vld [vmem:[%s2038_s29 + $0xc4] ss:$8 sps:$4 sm:$0xff]   ;;  %v1445_v49 = vld [vmem:[%s2038_s29 + $0xc0] ss:$8 sps:$4 sm:$0xff]  }
  0xa9   : > { %731 = vmatprep.subr.bf16.mxu0 %v1408_v14  ;;  %s412_s18 = scalar_lea.vmem [#allocation2], %s2089_s21  ;;  %v1447_v50 = vld [vmem:[%s2038_s29 + $0xb4] ss:$8 sps:$4 sm:$0xff]   ;;  %v1451_v51 = vld [vmem:[%s2038_s29 + $0xb0] ss:$8 sps:$4 sm:$0xff]   ;;  %s406_s12 = sld [smem:[#allocation4 + %s2082_s22]] }
  0xaa   : > { %v413_v36 = vld [vmem:[%s412_s18] sm:$0xff]  ;;  %v414_v40 = vld [vmem:[%s412_s18 + $0x8] sm:$0xff]  ;;  %s417_s6 = scalar_lea.vmem [#allocation2], %s2096_s15  ;;  %v1459_v54 = vld [vmem:[%s2038_s29 + $0x94] ss:$8 sps:$4 sm:$0xff]   ;;  %v474_v14 = vshrl.u32 %v473_v13, 7 }
  0xab   : > { %773 = vmatpush1.bf16.msra.mxu1 %v1440_v25  ;;  %v421_v42 = vpack.c.bf16 %v414_v40, %v413_v36  ;;  %v418_v44 = vld [vmem:[%s417_s6] sm:$0xff]  ;;  %v419_v45 = vld [vmem:[%s417_s6 + $0x8] sm:$0xff]  ;;  %v1463_v55 = vld [vmem:[%s2038_s29 + $0x90] ss:$8 sps:$4 sm:$0xff]  }
  0xac   : > { %732 = vmatpush1.bf16.msra.mxu0 %v1410_v17  ;;  %774 = vmatprep.subr.bf16.mxu1 %v1443_v26  ;;  %v422_v48 = vpack.c.bf16 %v419_v45, %v418_v44  ;;  %v1453_v52 = vld [vmem:[%s2038_s29 + $0xa4] ss:$8 sps:$4 sm:$0xff]   ;;  %v1457_v53 = vld [vmem:[%s2038_s29 + $0xa0] ss:$8 sps:$4 sm:$0xff]   ;;  %v1468_v62 = vld [vmem:[%s2046_s20 + $0x70] ss:$8 sps:$4 sm:$0xff]  }
  0xad   : > { %733 = vmatprep.subr.bf16.mxu0 %v1411_v18  ;;  %755 = vmatprep.mubr.bf16.mxu0 %v421_v42  ;;  %v1465_v56 = vld [vmem:[%s2038_s29 + $0x84] ss:$8 sps:$4 sm:$0xff]   ;;  %v1467_v57 = vld [vmem:[%s2038_s29 + $0x80] ss:$8 sps:$4 sm:$0xff]   ;;  %v1474_v2 = vld [vmem:[%s2046_s20 + $0x50] ss:$8 sps:$4 sm:$0xff]  }
  0xae   : > { %v1470_v61 = vld [vmem:[%s2046_s20 + $0x74] ss:$8 sps:$4 sm:$0xff]   ;;  %v1473_v63 = vld [vmem:[%s2046_s20 + $0x64] ss:$8 sps:$4 sm:$0xff]   ;;  %v1471_v0 = vld [vmem:[%s2046_s20 + $0x60] ss:$8 sps:$4 sm:$0xff]  }
  0xaf   : > { %775 = vmatpush1.bf16.msra.mxu1 %v1446_v28  ;;  %s407_s23 = scalar_lea.vmem [#allocation2], %s406_s12  ;;  %v1476_v1 = vld [vmem:[%s2046_s20 + $0x54] ss:$8 sps:$4 sm:$0xff]   ;;  %v1479_v3 = vld [vmem:[%s2046_s20 + $0x44] ss:$8 sps:$4 sm:$0xff]   ;;  %v479_v15 = vsub.s32 1, %v474_v14 }
  0xb0   : > { %734 = vmatpush1.bf16.msra.mxu0 %v1413_v21  ;;  %776 = vmatprep.subr.bf16.mxu1 %v1449_v30  ;;  %v408_v58 = vld [vmem:[%s407_s23] sm:$0xff]  ;;  %v409_v59 = vld [vmem:[%s407_s23 + $0x8] sm:$0xff]  ;;  %v1486_v10 = vld [vmem:[%s2046_s20 + $0x10] ss:$8 sps:$4 sm:$0xff]  }
  0xb1   : > { %735 = vmatprep.subr.bf16.mxu0 %v1414_v23  ;;  %v420_v60 = vpack.c.bf16 %v409_v59, %v408_v58  ;;  %v1477_v4 = vld [vmem:[%s2046_s20 + $0x40] ss:$8 sps:$4 sm:$0xff]   ;;  %v1482_v6 = vld [vmem:[%s2046_s20 + $0x34] ss:$8 sps:$4 sm:$0xff]   ;;  %v1485_v7 = vld [vmem:[%s2046_s20 + $0x24] ss:$8 sps:$4 sm:$0xff]  }
  0xb2   : > { %v1483_v8 = vld [vmem:[%s2046_s20 + $0x20] ss:$8 sps:$4 sm:$0xff]   ;;  %v1488_v9 = vld [vmem:[%s2046_s20 + $0x14] ss:$8 sps:$4 sm:$0xff]   ;;  %v1491_v11 = vld [vmem:[%s2046_s20 + $0x4] ss:$8 sps:$4 sm:$0xff]  }
  0xb3   : > { %777 = vmatpush1.bf16.msra.mxu1 %v1452_v32  ;;  %v1489_v12 = vld [vmem:[%s2046_s20] ss:$8 sps:$4 sm:$0xff]   ;;  %v471_v17 = vld [vmem:[%s2044_s24] sm:$0x3] }
  0xb4   : > { %736 = vmatpush1.bf16.msra.mxu0 %v1416_v24  ;;  %778 = vmatprep.subr.bf16.mxu1 %v1455_v34  ;;  %v480_v18 = vrot.slane %v471_v17, %v479_v15 }
  0xb5   : > { %737 = vmatprep.subr.bf16.mxu0 %v1417_v27 }
  0xb7   : > { %779 = vmatpush1.bf16.msra.mxu1 %v1458_v38 }
  0xb8   : > { %738 = vmatpush1.bf16.msra.mxu0 %v1421_v29  ;;  %780 = vmatprep.subr.bf16.mxu1 %v1461_v39 }
  0xb9   : > { %739 = vmatprep.subr.bf16.mxu0 %v1423_v31  ;;  %v475_v31 = vsub.s32 0, %v474_v14 }
  0xbb   : > { %781 = vmatpush1.bf16.msra.mxu1 %v1464_v43 }
  0xbc   : > { %740 = vmatpush2.bf16.msra.mxu0 %v1427_v33  ;;  %934 = vmatprep.subr.bf16.mxu1 %v1470_v61  ;;  %v476_v33 = vrot.slane %v471_v17, %v475_v31 }
  0xbd   : > { %741 = vmatprep.subr.bf16.mxu0 %v1429_v35 }
  0xbe   : > { %799 = vmatmul.mubr.bf16.vlgmr.msra.gmra.mxu1 %v422_v48 }
  0xbf   : > { %966 = vmatprep.mubr.bf16.mxu1 %v1764_v5  ;;  %935 = vmatpush1.bf16.msra.mxu1 %v1468_v62  ;;  %v1480_v5 = vld [vmem:[%s2046_s20 + $0x30] ss:$8 sps:$4 sm:$0xff]  }
  0xc0   : > { %742 = vmatpush2.bf16.msra.mxu0 %v1433_v37  ;;  %936 = vmatprep.subr.bf16.mxu1 %v1473_v63 }
  0xc1   : > { %743 = vmatprep.subr.bf16.mxu0 %v1435_v41 }
  0xc3   : > { %937 = vmatpush1.bf16.msra.mxu1 %v1471_v0 }
  0xc4   : > { %744 = vmatpush2.bf16.msra.mxu0 %v1439_v46  ;;  %938 = vmatprep.subr.bf16.mxu1 %v1476_v1 }
  0xc5   : > { %745 = vmatprep.subr.bf16.mxu0 %v1441_v47 }
  0xc7   : > { %939 = vmatpush1.bf16.msra.mxu1 %v1474_v2 }
  0xc8   : > { %746 = vmatpush2.bf16.msra.mxu0 %v1445_v49  ;;  %940 = vmatprep.subr.bf16.mxu1 %v1479_v3  ;;  %v842_v49 = vld [vmem:[%s2057_s1] sm:$0x3] }
  0xc9   : > { %747 = vmatprep.subr.bf16.mxu0 %v1447_v50  ;;  %v847_v50 = vrot.slane %v842_v49, %v475_v31 }
  0xcb   : > { %941 = vmatpush1.bf16.msra.mxu1 %v1477_v4 }
  0xcc   : > { %748 = vmatpush2.bf16.msra.mxu0 %v1451_v51  ;;  %942 = vmatprep.subr.bf16.mxu1 %v1482_v6  ;;  %v851_v51 = vrot.slane %v842_v49, %v479_v15 }
  0xcd   : > { %749 = vmatprep.subr.bf16.mxu0 %v1453_v52 }
  0xcf   : > { %943 = vmatpush1.bf16.msra.mxu1 %v1480_v5 }
  0xd0   : > { %750 = vmatpush2.bf16.msra.mxu0 %v1457_v53  ;;  %944 = vmatprep.subr.bf16.mxu1 %v1485_v7 }
  0xd1   : > { %751 = vmatprep.subr.bf16.mxu0 %v1459_v54 }
  0xd3   : > { %945 = vmatpush1.bf16.msra.mxu1 %v1483_v8 }
  0xd4   : > { %752 = vmatpush2.bf16.msra.mxu0 %v1463_v55  ;;  %946 = vmatprep.subr.bf16.mxu1 %v1488_v9 }
  0xd5   : > { %753 = vmatprep.subr.bf16.mxu0 %v1465_v56 }
  0xd7   : > { %947 = vmatpush1.bf16.msra.mxu1 %v1486_v10 }
  0xd8   : > { %754 = vmatpush2.bf16.msra.mxu0 %v1467_v57  ;;  %948 = vmatprep.subr.bf16.mxu1 %v1491_v11 }
  0xdb   : > { %756 = vmatmul.mubr.bf16.vlgmr.msra.gmra.mxu0 %v420_v60  ;;  %949 = vmatpush1.bf16.msra.mxu1 %v1489_v12 }
 0x17e   : > { %v800_v16 = vpop.f32.mrf.mxu1 }
 0x180   : > { %v802_v19 = vpop.f32.mrf.mxu1 }
 0x182   : > { %v804_v23 = vpop.f32.mrf.mxu1 }
 0x184   : > { %v806_v29 = vpop.f32.mrf.mxu1 }
 0x19b   : > { %v757_v20 = vpop.f32.mrf.mxu0 }
 0x19c   : > { %v758_v34 = vadd.f32 %v757_v20, %v476_v33 }
 0x19d   : > { %v759_v21 = vpop.f32.mrf.mxu0 }
 0x19e   : > { %v760_v22 = vadd.f32 %v759_v21, %v480_v18  ;;  %v801_v37 = vadd.f32 %v800_v16, %v758_v34 }
 0x19f   : > { %v761_v24 = vpop.f32.mrf.mxu0 }
 0x1a0   : > { %v803_v25 = vadd.f32 %v802_v19, %v760_v22  ;;  %v762_v35 = vadd.f32 %v761_v24, %v476_v33 }
 0x1a1   : > { %v763_v26 = vpop.f32.mrf.mxu0 }
 0x1a2   : > { %v1241_v27 = vmul.f32 -1.442695, %v803_v25  ;;  %v764_v28 = vadd.f32 %v763_v26, %v480_v18  ;;  %v805_v39 = vadd.f32 %v804_v23, %v762_v35 }
 0x1a4   : > { %1492 = vpow2.f32 %v1241_v27  ;;  %v807_v30 = vadd.f32 %v806_v29, %v764_v28 }
 0x1a6   : > { %v1242_v32 = vmul.f32 -1.442695, %v807_v30 }
 0x1a8   : > { %1494 = vpow2.f32 %v1242_v32 }
 0x1a9   : > { %1496 = vtanh.f32 %v801_v37 }
 0x1b1   : > { %v1493_v36 = vpop.eup %1492 }
 0x1b2   : > { %v817_v38 = vadd.f32 1.0, %v1493_v36 }
 0x1b4   : > { %1498 = vrcp.f32 %v817_v38 }
 0x1b5   : > { %v1495_v40 = vpop.eup %1494  ;;  %1500 = vtanh.f32 %v805_v39 }
 0x1b6   : > { %v818_v41 = vadd.f32 1.0, %v1495_v40  ;;  %v1497_v42 = vpop.eup %1496 }
 0x1b8   : > { %1502 = vrcp.f32 %v818_v41 }
 0x1c1   : > { %v1499_v43 = vpop.eup %1498 }
 0x1c2   : > { %v1501_v44 = vpop.eup %1500  ;;  %v823_v46 = vmul.f32 %v1499_v43, %v1497_v42 }
 0x1c5   : > { %v1503_v45 = vpop.eup %1502 }
 0x1c6   : > { %v824_v47 = vmul.f32 %v1503_v45, %v1501_v44 }
 0x1c8   : > { %v825_v48 = vpack.c.bf16 %v824_v47, %v823_v46 }
 0x1ca   : > { %967 = vmatmul.mubr.bf16.vlgmr.msra.gmra.mxu1 %v825_v48 }
 0x28a   : > { %v968_v52 = vpop.f32.mrf.mxu1 }
 0x28b   : > { %v969_v53 = vadd.f32 %v968_v52, %v847_v50 }
 0x28c   : > { %v970_v54 = vpop.f32.mrf.mxu1 }
 0x28d   : > { %v971_v55 = vadd.f32 %v970_v54, %v851_v51  ;;  %980 = sbr.rel (%p1259_p3) target bundleno = 662 (0x296), region = 64 }
 0x28e   : > { %v972_v56 = vpop.f32.mrf.mxu1 }
 0x28f   : > { %v973_v57 = vadd.f32 %v972_v56, %v847_v50 }
 0x290   : > { %v974_v58 = vpop.f32.mrf.mxu1 }
 0x291   : > { %v975_v59 = vadd.f32 %v974_v58, %v851_v51 }
 0x292   : > { %v981_v60 = vld [vmem:[#allocation2 + $0x4] sm:$0xff]  ;;  %v982_v61 = vld [vmem:[#allocation2 + $0xc] sm:$0xff] }
 0x293   : > { %v983_v62 = vadd.f32 %v981_v60, %v969_v53  ;;  %v984_v63 = vadd.f32 %v982_v61, %v973_v57 }
 0x295   : > { %985 = vst [vmem:[#allocation2 + $0x4] sm:$0xff] %v983_v62  ;;  %986 = vst [vmem:[#allocation2 + $0xc] sm:$0xff] %v984_v63 }
 0x296 PF: > { %s2280_s29 = sld [smem:[#allocation22_spill]]  ;;  %v987_v0 = vld [vmem:[%s2059_s16] sm:$0xff]  ;;  %v988_v1 = vld [vmem:[%s2059_s16 + $0x8] sm:$0xff]  ;;  %s1007_s14 = sshll.u32 %s2059_s16, 4  ;;  %s2154_s14 = int_to_ptr.vmem [resolvable:$true] %s1007_s14 }
 0x297   : > { %v989_v2 = vadd.f32 %v987_v0, %v971_v55  ;;  %v990_v3 = vadd.f32 %v988_v1, %v975_v59  ;;  %s2282_s5 = sld [smem:[#allocation32_spill]]  ;;  %s994_s2 = scalar_lea.sflag [#allocation7], %s2028_s8 }
 0x298   : > { %s1624_s1 = scalar_lea.vmem %s2154_s14, 256  ;;  %s1765_s13 = smov [#allocation13]  }
 0x299   : > { %991 = vst [vmem:[%s2059_s16] sm:$0xff] %v989_v2  ;;  %992 = vst [vmem:[%s2059_s16 + $0x8] sm:$0xff] %v990_v3  ;;  %p1625_p9 = scmp.ne.s32.totalorder %s2154_s14, %s1624_s1  ;;  %s1628_s22 = sshll.u32 %s1765_s13, 4  ;;  %s1629_s22 = int_to_ptr.vmem [resolvable:$false] %s1628_s22 }
 0x29a   : > { %s1630_s28 = scalar_lea.vmem %s1629_s22, 512  ;;  %p1631_p4 = scmp.lt.s32.totalorder %s2154_s14, %s1629_s22 }
 0x29b   : > { %p1626_p6 = pnand %p1625_p9, %p1958_p12  ;;  %p1632_p11 = scmp.lt.s32.totalorder %s1630_s28, %s1624_s1 }
 0x29c   : > { %s1268_s20 = sshll.u32 %s2280_s29, 8 }
 0x29d   : > { %s2151_s25 = scalar_lea.hbm %s2282_s5, %s1268_s20  ;;  %p1627_p7 = pneg %p1626_p6 }
 0x29e   : > { %p1633_p13 = por %p1632_p11, %p1631_p4 }
 0x2a0   : > { %p1634_p10 = pnand %p1633_p13, %p1627_p7 }
 0x2a2   : > { %1637 = shalt.err (!%p1634_p10)
}
 0x2a3   : > { %s1638_s16 = scalar_lea.hbm %s2151_s25, 256  ;;  %s1642_s15 = scalar_lea.hbm %s2282_s5, 512 }
 0x2a4   : > { %p1639_p2 = scmp.ne.s32.totalorder %s2151_s25, %s1638_s16  ;;  %p1643_p5 = scmp.lt.s32.totalorder %s2151_s25, %s2282_s5 }
 0x2a5   : > { %p1644_p8 = scmp.lt.s32.totalorder %s1642_s15, %s1638_s16 }
 0x2a6   : > { %p1640_p1 = pnand %p1639_p2, %p1958_p12 }
 0x2a7   : > { %p1645_p3 = por %p1644_p8, %p1643_p5 }
 0x2a8   : > { %p1641_p0 = pneg %p1640_p1 }
 0x2aa   : > { %p1646_p9 = pnand %p1645_p3, %p1641_p0 }
 0x2ac   : > { %1649 = shalt.err (!%p1646_p9)
}
 0x2ad   : > { %s1766_s12 = smov 128   ;;  %s1767_s23 = smov 8  }
 0x2ae   : > { %1280 = dma.vmem_to_hbm [thread:$0]  (%p1958_p12), %s2154_s14, 256, %s2151_s25, %s994_s2, %s1766_s12, %s1766_s12, %s1767_s23  }
 0x2af PF: > { %p1300_p6 = scmp.ge.s32.totalorder %s1754_s9, 2  ;;  %s1022_s29 = sand.u32 1, %s1726_s27  }
 0x2b0   : > { %p2283_p7 = scmp.ne.s32.totalorder %s2267_s30, 0  ;;  %s1023_s20 = scalar_lea.sflag [#allocation7], %s1022_s29 }
 0x2b2   : > { %p1296_p4 = pnand %p1300_p6, %p2283_p7 }
 0x2b4   : > { %p1297_p11 = pneg %p1296_p4 }
 0x2b6   : > { %1709 = dma.done.wait (%p1297_p11), %s1023_s20, 256  }
 0x2b7   : > { %1711 = vsyncadd (%p1297_p11), %s1023_s20, 4294967040  ;;  %s32_s9 = sadd.s32 1, %s1754_s9   ;;  %s2284_s24 = sld [smem:[#allocation19_spill]] }
 0x2b8   : > { %p29_p13 = scmp.ge.s32.totalorder %s32_s9, 8   ;;  %s2285_s8 = sld [smem:[#allocation20_spill]] }
 0x2b9   : > { %s2286_s28 = sld [smem:[#allocation28_spill]]  ;;  %s2290_s25 = smov %s1722_s26 }
 0x2ba   : > { %s2287_s30 = sld [smem:[#allocation23_spill]]  ;;  %s2291_s26 = smov %s1965_s19 }
 0x2bb   : > { %s2288_s11 = sld [smem:[#allocation24_spill]]  ;;  %s2292_s27 = smov %s1730_s0 }
 0x2bc   : > { %s2289_s17 = sld [smem:[#allocation25_spill]]  ;;  %s2294_s29 = smov %s1746_s7 }
 0x2be   : > { %s2293_s0 = smov %s2285_s8  ;;  %31 = sbr.rel (!%p29_p13) target bundleno = 22 (0x16), region = 136 }
 0x2c1   : > { %s2295_s7 = smov %s2288_s11 }
 0x2c2   : > { %s2296_s8 = smov %s2289_s17 }
 0x2c3   :  { %1028 = vsyncpa [#allocation6], 1 }
 0x2c4   :  { %1030 = vsyncpa [#allocation6 + $0x1], 1 }
 0x2c5   :  { %1031 = vsyncpa [#allocation9], 1 }
 0x2c6   :  { %1033 = vsyncpa [#allocation9 + $0x1], 1 }
 0x2c7   :  { %1034 = vsyncpa [#allocation12], 1 }
 0x2c8   :  { %1036 = vsyncpa [#allocation12 + $0x1], 1 }
 0x2c9   :  { %1037 = vsyncpa [#allocation7], 1 }
 0x2ca   :  { %1039 = vsyncpa [#allocation7 + $0x1], 1 }

</bundles_post_ra>
